<compile_context>
chip_gen: v7x
topology: tpu7x:2x2x1
jax: 0.10.0
libtpu: 0.0.40
codegen_flags: <defaults>
</compile_context>

<pallas_src>
import functools

import jax
import jax.numpy as jnp
from jax.experimental import pallas as pl
from jax.experimental.pallas import tpu as pltpu


# ----------------------------------------------------------------------------
# Fused single-pass kernel: one HBM read + one write per element.
# ----------------------------------------------------------------------------
def _ca_fused_kernel(x_ref, w1_ref, b1_ref, w2_ref, b2_ref, o_ref, *, inv_s):
    # x_ref: (Bt, C, S) -- Bt batch elements, spatial flattened on the lane axis.
    # Pool with f32 accumulation WITHOUT materializing an f32 copy of the slab.
    pooled = jnp.sum(x_ref[...], axis=-1, dtype=jnp.float32) * inv_s        # (Bt, C)

    # Squeeze conv (C -> Ch): tiny, run on VPU (broadcast-mul + lane reduce).
    w1 = w1_ref[...].astype(jnp.float32)                                    # (Ch, C)
    h = jnp.sum(pooled[:, None, :] * w1[None, :, :], axis=-1)               # (Bt, Ch)
    h = jnp.maximum(h + b1_ref[...].astype(jnp.float32), 0.0)

    # Excite conv (Ch -> C) + sigmoid gate.
    w2 = w2_ref[...].astype(jnp.float32)                                    # (C, Ch)
    a = jnp.sum(h[:, None, :] * w2[None, :, :], axis=-1)                    # (Bt, C)
    a = jax.nn.sigmoid(a + b2_ref[...].astype(jnp.float32))

    # Scale in the input dtype; gate cast down once (tiny).
    o_ref[...] = x_ref[...] * a.astype(o_ref.dtype)[:, :, None]


# ----------------------------------------------------------------------------
# Spatial-tiling fallback kernels (per-batch slab too big for VMEM).
# ----------------------------------------------------------------------------
def _pool_kernel(x_ref, o_ref, *, s_total, st, masked):
    # x_ref: (1, C, st); o_ref: (1, C, 1) f32 accumulator, resident across axis 1.
    @pl.when(pl.program_id(1) == 0)
    def _():
        o_ref[...] = jnp.zeros_like(o_ref)

    x = x_ref[...]
    if masked:  # zero out the out-of-bounds lanes of the last spatial tile
        lane = jax.lax.broadcasted_iota(jnp.int32, x.shape, 2)
        valid = (pl.program_id(1) * st + lane) < s_total
        x = jnp.where(valid, x, jnp.zeros_like(x))
    o_ref[...] += jnp.sum(x, axis=-1, keepdims=True, dtype=jnp.float32)


def _scale_kernel(x_ref, a_ref, o_ref):
    # x_ref/o_ref: (1, C, st); a_ref: (1, C, 1) f32 gate.
    o_ref[...] = x_ref[...] * a_ref[...].astype(o_ref.dtype)


# ----------------------------------------------------------------------------
# Wrapper.
# ----------------------------------------------------------------------------
def _default_vmem_limit_bytes():
    cap = 64 << 20  # conservative default: v7x has 64 MiB physical VMEM per TC
    try:
        info = pltpu.get_tpu_info()
        cap = int(getattr(info, "vmem_capacity_bytes", cap)) or cap
    except Exception:
        pass
    return (cap * 3) // 4  # 48 MiB on v7x, 96 MiB on v5e/v6e


def _pick_batch_tile(B, per_batch_bytes, tile_budget):
    """Largest-useful batch tile: ~2 MiB tiles, >= min(4, B) grid steps."""
    max_bt = max(1, min(B, tile_budget // (4 * per_batch_bytes)))
    target_bt = max(1, (2 << 20) // per_batch_bytes)
    bt = min(max_bt, target_bt, B)
    min_steps = min(4, B)
    while bt > 1 and pl.cdiv(B, bt) < min_steps:
        bt -= 1
    # Prefer a nearby exact divisor of B to avoid a ragged tail tile.
    for d in range(bt, 0, -1):
        if B % d == 0:
            if d * 2 >= bt:
                bt = d
            break
    return bt


def _channel_attention_spatial(x_flat, w1, b1, w2, b2, S, tile_budget,
                               vmem_limit, spatial_chunk=None):
    """Two-sweep path for oversized per-batch slabs."""
    B, C, _ = x_flat.shape
    itemsize = jnp.dtype(x_flat.dtype).itemsize

    if spatial_chunk is None:
        st = (tile_budget // (4 * C * itemsize)) // 128 * 128
        st = max(st, 128)
    else:
        st = int(spatial_chunk)
    st = min(st, S)  # full extent if the chunk covers everything
    ns = pl.cdiv(S, st)
    masked = (S % st) != 0

    # Pass 1: per-(b, c) spatial sum, accumulated across the spatial grid axis.
    pooled = pl.pallas_call(
        functools.partial(_pool_kernel, s_total=S, st=st, masked=masked),
        out_shape=jax.ShapeDtypeStruct((B, C, 1), jnp.float32),
        grid_spec=pltpu.PrefetchScalarGridSpec(
            num_scalar_prefetch=0,
            grid=(B, ns),
            in_specs=[pl.BlockSpec((1, C, st), lambda b, s: (b, 0, s))],
            out_specs=pl.BlockSpec((1, C, 1), lambda b, s: (b, 0, 0)),
        ),
        compiler_params=pltpu.CompilerParams(
            dimension_semantics=("parallel", "arbitrary"),
            vmem_limit_bytes=int(vmem_limit),
        ),
    )(x_flat)

    # Tiny squeeze-excite on the pooled vector: a few hundred flops, plain JAX.
    pooled = pooled[:, :, 0] * (1.0 / float(S))                            # (B, C)
    h = jnp.maximum(pooled @ w1.T.astype(jnp.float32)
                    + b1.reshape(1, -1).astype(jnp.float32), 0.0)          # (B, Ch)
    a = jax.nn.sigmoid(h @ w2.T.astype(jnp.float32)
                       + b2.reshape(1, -1).astype(jnp.float32))            # (B, C)
    a = a.reshape(B, C, 1).astype(jnp.float32)

    # Pass 2: apply the gate tile-by-tile.
    out = pl.pallas_call(
        _scale_kernel,
        out_shape=jax.ShapeDtypeStruct((B, C, S), x_flat.dtype),
        grid_spec=pltpu.PrefetchScalarGridSpec(
            num_scalar_prefetch=0,
            grid=(B, ns),
            in_specs=[pl.BlockSpec((1, C, st), lambda b, s: (b, 0, s)),
                      pl.BlockSpec((1, C, 1), lambda b, s: (b, 0, 0))],
            out_specs=pl.BlockSpec((1, C, st), lambda b, s: (b, 0, s)),
        ),
        compiler_params=pltpu.CompilerParams(
            dimension_semantics=("parallel", "parallel"),
            vmem_limit_bytes=int(vmem_limit),
        ),
    )(x_flat, a)
    return out


def channel_attention(x, w1, b1, w2, b2, *, vmem_limit_bytes=None,
                      spatial_tiling=None, spatial_chunk=None):
    """x: (B, C, D, H, W). w1: (Ch, C), b1: (Ch, 1), w2: (C, Ch), b2: (C, 1)."""
    B, C, D, H, W = x.shape
    S = D * H * W
    Ch = w1.shape[0]
    itemsize = jnp.dtype(x.dtype).itemsize

    if vmem_limit_bytes is None:
        vmem_limit_bytes = _default_vmem_limit_bytes()
    vmem_limit_bytes = int(vmem_limit_bytes)
    # Leave headroom for weights / compiler scratch inside the requested limit.
    tile_budget = max(vmem_limit_bytes - (4 << 20), 2 << 20)

    # No padding: the full spatial extent is the last block dim (exempt from the
    # 128-divisibility rule); tail stores are masked by the hardware.
    x_flat = x.reshape(B, C, S)
    per_batch_bytes = C * S * itemsize

    use_spatial = spatial_tiling
    if use_spatial is None:
        # Even a single batch slab cannot be double-buffered (in + out) in VMEM.
        use_spatial = 4 * per_batch_bytes > tile_budget
    if use_spatial:
        out_flat = _channel_attention_spatial(
            x_flat, w1, b1, w2, b2, S, tile_budget, vmem_limit_bytes,
            spatial_chunk=spatial_chunk)
        return out_flat.reshape(B, C, D, H, W)

    # --- Fused single-pass path -------------------------------------------
    bt = _pick_batch_tile(B, per_batch_bytes, tile_budget)
    grid_b = pl.cdiv(B, bt)

    # Lane-major biases: (1, Ch)/(1, C) load as a single dense vreg row.
    b1_l = b1.reshape(1, Ch)
    b2_l = b2.reshape(1, C)

    kernel = functools.partial(_ca_fused_kernel, inv_s=1.0 / float(S))

    param_bytes = (w1.size + w2.size + b1.size + b2.size) * itemsize
    cost = pl.CostEstimate(
        flops=2 * B * C * S + 4 * B * C * Ch,
        transcendentals=B * C,
        bytes_accessed=2 * B * C * S * itemsize + param_bytes,
    )

    out_flat = pl.pallas_call(
        kernel,
        out_shape=jax.ShapeDtypeStruct((B, C, S), x.dtype),
        grid_spec=pltpu.PrefetchScalarGridSpec(
            num_scalar_prefetch=0,
            grid=(grid_b,),
            in_specs=[
                pl.BlockSpec((bt, C, S), lambda b: (b, 0, 0)),   # x tile (Bt batches)
                pl.BlockSpec((Ch, C), lambda b: (0, 0)),         # w1 (shared)
                pl.BlockSpec((1, Ch), lambda b: (0, 0)),         # b1 lane-major
                pl.BlockSpec((C, Ch), lambda b: (0, 0)),         # w2 (shared)
                pl.BlockSpec((1, C), lambda b: (0, 0)),          # b2 lane-major
            ],
            out_specs=pl.BlockSpec((bt, C, S), lambda b: (b, 0, 0)),
        ),
        compiler_params=pltpu.CompilerParams(
            dimension_semantics=("parallel",),   # batch axis shards across v7x's 2 TCs
            vmem_limit_bytes=vmem_limit_bytes,
        ),
        cost_estimate=cost,
    )(x_flat, w1, b1_l, w2, b2_l)

    return out_flat.reshape(B, C, D, H, W)


def channel_attention_ref(x, w1, b1, w2, b2):
    """Plain-JAX reference mirroring the PyTorch module."""
    y = jnp.mean(x, axis=(2, 3, 4))                       # (B, C)
    h = jnp.maximum(y @ w1.T + b1[:, 0], 0.0)             # (B, Ch)
    a = jax.nn.sigmoid(h @ w2.T + b2[:, 0])               # (B, C)
    return x * a[:, :, None, None, None]


if __name__ == "__main__":
    # Small shapes consistent with the module: num_feat=16, squeeze_factor=8.
    # W=9 makes S=288 (not a multiple of 128) to exercise the unpadded path.
    B, C, D, H, W = 2, 16, 4, 8, 9
    squeeze_factor = 8
    Ch = C // squeeze_factor

    key = jax.random.PRNGKey(0)
    kx, k1, k2, k3, k4 = jax.random.split(key, 5)

    x = jax.random.normal(kx, (B, C, D, H, W), dtype=jnp.float32)
    # Deterministic synthetic parameters (Conv3d 1x1x1 weights collapsed to 2D).
    w1 = 0.1 * jax.random.normal(k1, (Ch, C), dtype=jnp.float32)
    b1 = 0.1 * jax.random.normal(k2, (Ch, 1), dtype=jnp.float32)
    w2 = 0.1 * jax.random.normal(k3, (C, Ch), dtype=jnp.float32)
    b2 = 0.1 * jax.random.normal(k4, (C, 1), dtype=jnp.float32)

    ref = channel_attention_ref(x, w1, b1, w2, b2)

    # Fused single-pass path (default).
    out = jax.block_until_ready(channel_attention(x, w1, b1, w2, b2))
    assert out.shape == (B, C, D, H, W)
    assert jnp.allclose(out, ref, rtol=1e-4, atol=1e-4), "fused path mismatch vs reference"

    # Also exercise the spatial-tiling fallback path (forced; 128-lane chunks).
    out_fb = jax.block_until_ready(
        channel_attention(x, w1, b1, w2, b2, spatial_tiling=True, spatial_chunk=128))
    assert jnp.allclose(out_fb, ref, rtol=1e-4, atol=1e-4), "spatial path mismatch vs reference"

    print("KERNEL_OK")
</pallas_src>

<mosaic_0001>
module attributes {stable_mosaic.version = 11 : i64} {
  func.func @_ca_fused_kernel(%arg0: i32, %arg1: memref<1x16x288xf32, #tpu.memory_space<vmem>>, %arg2: memref<2x16xf32, #tpu.memory_space<vmem>>, %arg3: memref<1x2xf32, #tpu.memory_space<vmem>>, %arg4: memref<16x2xf32, #tpu.memory_space<vmem>>, %arg5: memref<1x16xf32, #tpu.memory_space<vmem>>, %arg6: memref<1x16x288xf32, #tpu.memory_space<vmem>>) attributes {dimension_semantics = [#tpu.dimension_semantics<parallel>], iteration_bounds = array<i64: 2>, scalar_prefetch = 0 : i64, scratch_operands = 0 : i64, tpu.core_type = #tpu.core_type<tc>, window_params = [{transform_indices = @transform_0, window_bounds = array<i64: 1, 16, 288>}, {pipeline_mode = #tpu.pipeline_mode<synchronous>, transform_indices = @transform_1, window_bounds = array<i64: 2, 16>}, {pipeline_mode = #tpu.pipeline_mode<synchronous>, transform_indices = @transform_2, window_bounds = array<i64: 1, 2>}, {pipeline_mode = #tpu.pipeline_mode<synchronous>, transform_indices = @transform_3, window_bounds = array<i64: 16, 2>}, {pipeline_mode = #tpu.pipeline_mode<synchronous>, transform_indices = @transform_4, window_bounds = array<i64: 1, 16>}, {transform_indices = @transform_5, window_bounds = array<i64: 1, 16, 288>}]} {
    %c0 = arith.constant 0 : index
    %c0_0 = arith.constant 0 : index
    %c0_1 = arith.constant 0 : index
    %0 = vector.load %arg1[%c0, %c0_0, %c0_1] : memref<1x16x288xf32, #tpu.memory_space<vmem>>, vector<1x16x288xf32>
    %cst = arith.constant dense<0.000000e+00> : vector<1x16xf32>
    %1 = vector.multi_reduction <add>, %0, %cst [2] : vector<1x16x288xf32> to vector<1x16xf32>
    %cst_2 = arith.constant 0.00347222225 : f32
    %2 = vector.broadcast %cst_2 : f32 to vector<1x16xf32>
    %3 = arith.mulf %1, %2 : vector<1x16xf32>
    %c0_3 = arith.constant 0 : index
    %c0_4 = arith.constant 0 : index
    %4 = vector.load %arg2[%c0_3, %c0_4] : memref<2x16xf32, #tpu.memory_space<vmem>>, vector<2x16xf32>
    %5 = vector.shape_cast %3 : vector<1x16xf32> to vector<1x1x16xf32>
    %6 = vector.shape_cast %4 : vector<2x16xf32> to vector<1x2x16xf32>
    %7 = vector.broadcast %5 : vector<1x1x16xf32> to vector<1x2x16xf32>
    %8 = arith.mulf %7, %6 : vector<1x2x16xf32>
    %cst_5 = arith.constant dense<0.000000e+00> : vector<1x2xf32>
    %9 = vector.multi_reduction <add>, %8, %cst_5 [2] : vector<1x2x16xf32> to vector<1x2xf32>
    %c0_6 = arith.constant 0 : index
    %c0_7 = arith.constant 0 : index
    %10 = vector.load %arg3[%c0_6, %c0_7] : memref<1x2xf32, #tpu.memory_space<vmem>>, vector<1x2xf32>
    %11 = arith.addf %9, %10 : vector<1x2xf32>
    %cst_8 = arith.constant 0.000000e+00 : f32
    %12 = vector.broadcast %cst_8 : f32 to vector<1x2xf32>
    %13 = arith.maximumf %11, %12 : vector<1x2xf32>
    %c0_9 = arith.constant 0 : index
    %c0_10 = arith.constant 0 : index
    %14 = vector.load %arg4[%c0_9, %c0_10] : memref<16x2xf32, #tpu.memory_space<vmem>>, vector<16x2xf32>
    %15 = vector.shape_cast %13 : vector<1x2xf32> to vector<1x1x2xf32>
    %16 = vector.shape_cast %14 : vector<16x2xf32> to vector<1x16x2xf32>
    %17 = vector.broadcast %15 : vector<1x1x2xf32> to vector<1x16x2xf32>
    %18 = arith.mulf %17, %16 : vector<1x16x2xf32>
    %cst_11 = arith.constant dense<0.000000e+00> : vector<1x16xf32>
    %19 = vector.multi_reduction <add>, %18, %cst_11 [2] : vector<1x16x2xf32> to vector<1x16xf32>
    %c0_12 = arith.constant 0 : index
    %c0_13 = arith.constant 0 : index
    %20 = vector.load %arg5[%c0_12, %c0_13] : memref<1x16xf32, #tpu.memory_space<vmem>>, vector<1x16xf32>
    %21 = arith.addf %19, %20 : vector<1x16xf32>
    %22 = arith.negf %21 : vector<1x16xf32>
    %23 = math.exp %22 : vector<1x16xf32>
    %cst_14 = arith.constant 1.000000e+00 : f32
    %24 = vector.broadcast %cst_14 : f32 to vector<1x16xf32>
    %25 = arith.addf %24, %23 : vector<1x16xf32>
    %26 = arith.divf %24, %25 : vector<1x16xf32>
    %c0_15 = arith.constant 0 : index
    %c0_16 = arith.constant 0 : index
    %c0_17 = arith.constant 0 : index
    %27 = vector.load %arg1[%c0_15, %c0_16, %c0_17] : memref<1x16x288xf32, #tpu.memory_space<vmem>>, vector<1x16x288xf32>
    %28 = vector.shape_cast %26 : vector<1x16xf32> to vector<1x16x1xf32>
    %29 = vector.broadcast %28 : vector<1x16x1xf32> to vector<1x16x288xf32>
    %30 = arith.mulf %27, %29 : vector<1x16x288xf32>
    %c0_18 = arith.constant 0 : index
    %c0_19 = arith.constant 0 : index
    %c0_20 = arith.constant 0 : index
    %31 = vector.load %arg6[%c0_18, %c0_19, %c0_20] : memref<1x16x288xf32, #tpu.memory_space<vmem>>, vector<1x16x288xf32>
    tpu.vector_store %arg6[%c0_18, %c0_19, %c0_20], %30 {strides = array<i32>} : memref<1x16x288xf32, #tpu.memory_space<vmem>>, vector<1x16x288xf32>,
    return
  }
  func.func @transform_0(%arg0: i32) -> (i32, i32, i32) {
    %c0_i32 = arith.constant 0 : i32
    %c0_i32_0 = arith.constant 0 : i32
    %c0_i32_1 = arith.constant 0 : i32
    return %arg0, %c0_i32, %c0_i32_0 : i32, i32, i32
  }
  func.func @transform_1(%arg0: i32) -> (i32, i32) {
    %c0_i32 = arith.constant 0 : i32
    %c0_i32_0 = arith.constant 0 : i32
    %c0_i32_1 = arith.constant 0 : i32
    return %c0_i32, %c0_i32_0 : i32, i32
  }
  func.func @transform_2(%arg0: i32) -> (i32, i32) {
    %c0_i32 = arith.constant 0 : i32
    %c0_i32_0 = arith.constant 0 : i32
    %c0_i32_1 = arith.constant 0 : i32
    return %c0_i32, %c0_i32_0 : i32, i32
  }
  func.func @transform_3(%arg0: i32) -> (i32, i32) {
    %c0_i32 = arith.constant 0 : i32
    %c0_i32_0 = arith.constant 0 : i32
    %c0_i32_1 = arith.constant 0 : i32
    return %c0_i32, %c0_i32_0 : i32, i32
  }
  func.func @transform_4(%arg0: i32) -> (i32, i32) {
    %c0_i32 = arith.constant 0 : i32
    %c0_i32_0 = arith.constant 0 : i32
    %c0_i32_1 = arith.constant 0 : i32
    return %c0_i32, %c0_i32_0 : i32, i32
  }
  func.func @transform_5(%arg0: i32) -> (i32, i32, i32) {
    %c0_i32 = arith.constant 0 : i32
    %c0_i32_0 = arith.constant 0 : i32
    %c0_i32_1 = arith.constant 0 : i32
    return %arg0, %c0_i32, %c0_i32_0 : i32, i32, i32
  }
}

</mosaic_0001>

<bundles_post_ra>
// kernel: tpu_custom_call.1
= control target key start
LH: loop header
LB: loop body
LE: loop exit
PB: predicated region body
PF: predicated region fallthrough
CT: control target
= control target key end

     0   :  { %10 = vsyncpa [#allocation3], 0  ;;  %s1254_s0 = inlined_call_operand.hbm [shape: f32[2,16,288], index: 0, kind: input, shape index: {}]   ;;  %s1255_s1 = inlined_call_operand.vmem [shape: f32[2,16], index: 1, kind: input, shape index: {}]   ;;  %s1256_s2 = inlined_call_operand.vmem [shape: f32[1,2], index: 2, kind: input, shape index: {}]   ;;  %s1257_s3 = inlined_call_operand.vmem [shape: f32[16,2], index: 3, kind: input, shape index: {}]   ;;  %s1258_s4 = inlined_call_operand.vmem [shape: f32[1,16], index: 4, kind: input, shape index: {}]   ;;  %s1259_s5 = inlined_call_operand.hbm [shape: f32[2,16,288], index: 5, kind: output, shape index: {}]  }
   0x1   :  { %12 = vsyncpa [#allocation3 + $0x1], 0 }
   0x2   :  { %13 = vsyncpa [#allocation4], 0 }
   0x3   :  { %15 = vsyncpa [#allocation4 + $0x1], 0  ;;  %s1006_s18 = smov 0   ;;  %s1008_s19 = smov 0  }
   0x4   :  { %s1010_s20 = smov 0   ;;  %s1012_s21 = smov 0  }
   0x5 LB: > { %s1027_s22 = sadd.s32 4294967295, %s967_s21   ;;  %s794_s23 = sadd.s32 4294967294, %s967_s21   ;;  %s967_s21 = sphi %s1012_s21, %s1271_s21   ;;  %s963_s20 = sphi %s1010_s20, %s1270_s20   ;;  %s959_s19 = sphi %s1008_s19, %s1269_s19   ;;  %s955_s18 = sphi %s1006_s18, %s1268_s18  }
   0x6   : > { %s1031_s24 = sadd.s32 1, %s967_s21   ;;  %s28_s25 = sadd.s32 1, %s963_s20 }
   0x7   : > { %s25_s26 = ssub.s32 %s967_s21, %s1031_s24  ;;  %p35_p0 = scmp.ne.s32.totalorder %s963_s20, %s959_s19 }
   0x8   : > { %p26_p1 = scmp.eq.s32.totalorder %s25_s26, 0  ;;  %p36_p2 = scmp.eq.s32.totalorder %s967_s21, 0 }
   0x9   : > { %p41_p3 = scmp.ne.s32.totalorder %s959_s19, %s955_s18  ;;  %p42_p4 = scmp.eq.s32.totalorder %s1027_s22, 0 }
   0xa   : > { %s1043_s27 = scalar_select %p26_p1, %s963_s20, %s28_s25  }
   0xb   : > { %p37_p5 = por %p36_p2, %p35_p0  ;;  %p1045_p6 = por %p42_p4, %p41_p3 }
   0xc   : > { %p149_p7 = scmp.eq.s32.totalorder %s1027_s22, 1  ;;  %p155_p8 = scmp.eq.s32.totalorder %s794_s23, 1 }
   0xd   : > { %p822_p10 = scmp.lt.s32.totalorder %s967_s21, 2  ;;  %s187_s6 = sand.u32 1, %s963_s20  }
   0xe   : > { %p1052_p11 = por %p149_p7, %p35_p0  ;;  %p1056_p12 = por %p155_p8, %p41_p3 }
   0xf   : > { %s807_s7 = smul.u32 768, %s967_s21  ;;  %p1067_p13 = pnand %p822_p10, %p37_p5 }
  0x10   : > { %s1262_s29 = scalar_select %p1052_p11, 1, 0 }
  0x11   : > { %s1263_s30 = scalar_select %p1056_p12, 1, 0 }
  0x12   : > { %s806_s8 = smul.u32 48, %s187_s6  ;;  %s1065_s11 = scalar_lea.hbm %s1254_s0, %s807_s7 }
  0x13   : > { %s1073_s15 = scalar_lea.sflag [#allocation3], %s187_s6  ;;  %s871_s16 = scalar_lea.hbm %s1065_s11, 768 }
  0x14   : > { %s191_s13 = scalar_lea.vmem [#allocation2], %s806_s8  ;;  %p872_p0 = scmp.ne.s32.totalorder %s1065_s11, %s871_s16 }
  0x15   : > { %s198_s14 = sshll.u32 %s191_s13, 4  ;;  %p873_p1 = pneg %p1067_p13  ;;  %s1071_s14 = int_to_ptr.vmem [resolvable:$true] %s198_s14 }
  0x16   : > { %s876_s25 = scalar_lea.hbm %s1254_s0, 1536  ;;  %p877_p4 = scmp.lt.u32.totalorder %s1065_s11, %s1254_s0 }
  0x17   : > { %p874_p2 = pnand %p873_p1, %p872_p0  ;;  %p878_p5 = scmp.lt.u32.totalorder %s876_s25, %s871_s16 }
  0x18   : > { %p880_p8 = scmp.lt.u32.totalorder %s871_s16, %s1065_s11 }
  0x19   : > { %p875_p3 = pneg %p874_p2  ;;  %p879_p7 = por %p878_p5, %p877_p4 }
  0x1b   : > { %p881_p10 = por %p880_p8, %p879_p7 }
  0x1d   : > { %p882_p9 = pnand %p881_p10, %p875_p3 }
  0x1f   : > { %885 = shalt.err (!%p882_p9)
}
  0x20   : > { %s886_s6 = scalar_lea.vmem %s1071_s14, 768  ;;  %s969_s8 = smov [#allocation2]  }
  0x21   : > { %p887_p0 = scmp.ne.s32.totalorder %s1071_s14, %s886_s6  ;;  %s891_s9 = sshll.u32 %s969_s8, 4  ;;  %s892_s9 = int_to_ptr.vmem [resolvable:$false] %s891_s9 }
  0x22   : > { %s893_s10 = scalar_lea.vmem %s892_s9, 1536  ;;  %p894_p11 = scmp.lt.s32.totalorder %s1071_s14, %s892_s9 }
  0x23   : > { %p889_p2 = pnand %p887_p0, %p873_p1  ;;  %p895_p4 = scmp.lt.s32.totalorder %s893_s10, %s886_s6 }
  0x25   : > { %p890_p12 = pneg %p889_p2  ;;  %p896_p5 = por %p895_p4, %p894_p11 }
  0x27   : > { %p897_p7 = pnand %p896_p5, %p890_p12 }
  0x29   : > { %900 = shalt.err (!%p897_p7)
}
  0x2a   : > { %s970_s13 = smov 384   ;;  %s971_s16 = smov 24  }
  0x2b   : > { %817 = dma.hbm_to_vmem [thread:$0]  (!%p1067_p13), %s1065_s11, 768, %s1071_s14, %s1073_s15, %s970_s13, %s970_s13, %s971_s16  }
  0x2c   : > { %p798_p9 = scmp.ge.s32.totalorder %s967_s21, 1  ;;  %p206_p1 = scmp.lt.s32.totalorder %s967_s21, 3 }
  0x2e   : > { %p207_p3 = pnand %p798_p9, %p206_p1 }
  0x2f   : > { %s1104_s17 = sand.u32 (!%p207_p3), 1, %s959_s19  }
  0x30   : > { %210 = sbr.rel (%p207_p3) target bundleno = 981 (0x3d5), region = 40  ;;  %s213_s25 = scalar_lea.sflag (!%p207_p3), [#allocation3], %s1104_s17 }
  0x31   : > { %s808_s23 = smul.u32 (!%p207_p3), 48, %s1104_s17 }
  0x33   : > { %s216_s26 = scalar_lea.vmem (!%p207_p3), [#allocation2], %s808_s23 }
  0x37   : > { %946 = dma.done.wait (%p1045_p6), %s213_s25, 768  }
  0x38   : > { %948 = vsyncadd (%p1045_p6), %s213_s25, 4294966528  ;;  %v264_v0 = vlaneseq  ;;  %vm250_vm0 = vcmask 261120   ;;  %v1118_v3 = vld [vmem:[%s216_s26] sm:$0xff]  ;;  %v1120_v4 = vld [vmem:[%s216_s26 + $0x8] sm:$0xff]  ;;  %v972_v19 = vmov 0   ;;  %vm321_vm1 = vcmask 130112  }
  0x39   : > { %v1122_v5 = vld [vmem:[%s216_s26 + $0x10] sm:$0xff]  ;;  %v249_v6 = vadd.f32 %v1120_v4, %v1118_v3  ;;  %v1128_v8 = vld [vmem:[%s216_s26 + $0x18] sm:$0xff]  ;;  %v1130_v9 = vld [vmem:[%s216_s26 + $0x20] sm:$0xff]  ;;  %861 = vset.pattern.permute.xlu1 %v972_v19  ;;  %862 = vset.pattern.permute.xlu0 %v972_v19  ;;  %vm332_vm2 = vcmask 1041409   ;;  %vm335_vm3 = vcmask 123904   ;;  %vm628_vm4 = vcmask 1042434  }
  0x3a   : > { %v1115_v1 = vshrl.u32 %v264_v0, 7  ;;  %v251_v7 = vsel %vm250_vm0, %v1122_v5, 0.0  ;;  %v1132_v10 = vld [vmem:[%s216_s26 + $0x28] sm:$0xff]  ;;  %v255_v11 = vadd.f32 %v1130_v9, %v1128_v8  ;;  %v262_v13 = vld [vmem:[%s1255_s1] sm:$0x3]  ;;  %v311_v57 = vand.u32 127, %v264_v0 }
  0x3b   : > { %v256_v12 = vsel %vm250_vm0, %v1132_v10, 0.0  ;;  %v252_v14 = vadd.f32 %v251_v7, %v249_v6  ;;  %v799_v20 = vld [vmem:[%s1256_s2] ss:$0 sm:$0xff]  ;;  %v352_v33 = vld [vmem:[%s1257_s3 + $0x8] sm:$0xff]  ;;  %vm630_vm5 = vcmask 1043459   ;;  %vm632_vm6 = vcmask 1044484  }
  0x3c   : > { %v266_v2 = vsub.s32 0, %v1115_v1  ;;  %v257_v16 = vadd.f32 %v256_v12, %v255_v11  ;;  %v277_v17 = vsub.s32 1, %v1115_v1  ;;  %v351_v24 = vld [vmem:[%s1257_s3] sm:$0xff]  ;;  %v385_v37 = vsub.s32 4, %v1115_v1  ;;  %s242_s13 = scalar_lea.vmem [#allocation5], %s808_s23  ;;  %s809_s25 = smul.u32 768, %s1027_s22 }
  0x3d   : > { %253 = vadd.xlane.f32.xlu0 %v252_v14  ;;  %v399_v41 = vsub.s32 6, %v1115_v1  ;;  %v371_v42 = vsub.s32 2, %v1115_v1  ;;  %v378_v46 = vsub.s32 3, %v1115_v1  ;;  %v392_v50 = vsub.s32 5, %v1115_v1  ;;  %s721_s16 = sshll.u32 %s242_s13, 4  ;;  %s708_s28 = scalar_lea.sflag [#allocation4], %s1104_s17  ;;  %s1197_s16 = int_to_ptr.vmem [resolvable:$true] %s721_s16 }
  0x3e   : > { %v267_v15 = vrot.slane %v262_v13, %v266_v2  ;;  %v278_v18 = vrot.slane %v262_v13, %v277_v17  ;;  %v358_v26 = vrot.slane %v351_v24, %v266_v2  ;;  %v365_v31 = vrot.slane %v351_v24, %v277_v17  ;;  %s1208_s26 = scalar_lea.hbm %s1259_s5, %s809_s25  ;;  %s901_s11 = scalar_lea.vmem %s1197_s16, 768 }
  0x3f   : > { %v414_v35 = vrot.slane %v352_v33, %v266_v2  ;;  %v421_v39 = vrot.slane %v352_v33, %v277_v17  ;;  %v386_v40 = vrot.slane %v351_v24, %v385_v37  ;;  %v372_v43 = vrot.slane %v351_v24, %v371_v42  ;;  %p902_p6 = scmp.ne.s32.totalorder %s1197_s16, %s901_s11  ;;  %p1265_p11 = scmp.ne.s32.totalorder %s1262_s29, 0 }
  0x40   : > { %269 = vbcast.lane.b32.xlu1 %v267_v15, 256  ;;  %v456_v44 = vrot.slane %v352_v33, %v399_v41  ;;  %v428_v45 = vrot.slane %v352_v33, %v371_v42  ;;  %v379_v47 = vrot.slane %v351_v24, %v378_v46  ;;  %v435_v48 = vrot.slane %v352_v33, %v378_v46  ;;  %s973_s12 = smov [#allocation5]  }
  0x41   : > { %258 = vadd.xlane.f32.xlu0 %v257_v16  ;;  %v442_v49 = vrot.slane %v352_v33, %v385_v37  ;;  %v393_v51 = vrot.slane %v351_v24, %v392_v50  ;;  %v449_v52 = vrot.slane %v352_v33, %v392_v50  ;;  %v400_v53 = vrot.slane %v351_v24, %v399_v41  ;;  %p903_p12 = pnand %p902_p6, %p1265_p11  ;;  %s905_s14 = sshll.u32 %s973_s12, 4  ;;  %s906_s14 = int_to_ptr.vmem [resolvable:$false] %s905_s14 }
  0x42   : > { %v406_v54 = vsub.s32 7, %v1115_v1  ;;  %v316_v58 = vadd.s32 4294967288, %v311_v57  ;;  %v1160_v62 = vsub.s32 %v311_v57, %v1115_v1  ;;  %vm634_vm7 = vcmask 1045509   ;;  %s907_s15 = scalar_lea.vmem %s906_s14, 1536  ;;  %p908_p8 = scmp.lt.s32.totalorder %s1197_s16, %s906_s14 }
  0x43   : > { %vm636_vm8 = vcmask 1046534   ;;  %vm638_vm9 = vcmask 1047559   ;;  %vm649_vm10 = vcmask 15360   ;;  %p904_p13 = pneg %p903_p12  ;;  %p909_p10 = scmp.lt.s32.totalorder %s907_s15, %s901_s11 }
  0x44   : > { %273 = vbcast.lane.b32.xlu1 %v267_v15, 264  ;;  %v407_v55 = vrot.slane %v351_v24, %v406_v54  ;;  %v319_v60 = vsub.s32 %v316_v58, %v1115_v1  ;;  %v463_v15 = vrot.slane %v352_v33, %v406_v54 }
  0x45   : > { %p910_p0 = por %p909_p10, %p908_p8 }
  0x47   : > { %p911_p2 = pnand %p910_p0, %p904_p13 }
  0x48   : > { %284 = vbcast.lane.b32.xlu1 %v278_v18, 264 }
  0x57   : > { %280 = vbcast.lane.b32.xlu0 %v278_v18, 256 }
  0x5b   : > { %346 = vbcast.lane.b32.xlu0 %v799_v20, 256 }
  0x5f   : > { %360 = vbcast.lane.b32.xlu0 %v358_v26, 256 }
  0x63   : > { %367 = vbcast.lane.b32.xlu0 %v365_v31, 256 }
  0x67   : > { %416 = vbcast.lane.b32.xlu0 %v414_v35, 256 }
  0x6b   : > { %423 = vbcast.lane.b32.xlu0 %v421_v39, 256 }
  0x6f   : > { %374 = vbcast.lane.b32.xlu0 %v372_v43, 256 }
  0x73   : > { %430 = vbcast.lane.b32.xlu0 %v428_v45, 256 }
  0x77   : > { %381 = vbcast.lane.b32.xlu0 %v379_v47, 256 }
  0x7b   : > { %437 = vbcast.lane.b32.xlu0 %v435_v48, 256 }
  0x7f   : > { %444 = vbcast.lane.b32.xlu0 %v442_v49, 256 }
  0x83   : > { %395 = vbcast.lane.b32.xlu0 %v393_v51, 256 }
  0x87   : > { %451 = vbcast.lane.b32.xlu0 %v449_v52, 256 }
  0x8b   : > { %402 = vbcast.lane.b32.xlu0 %v400_v53, 256 }
  0x8f   : > { %409 = vbcast.lane.b32.xlu0 %v407_v55, 256 }
  0xb2   : > { %v270_v21 = vpop.permute.xlu1 %269 }
  0xb6   : > { %v274_v29 = vpop.permute.xlu1 %273 }
  0xba   : > { %v285_v36 = vpop.permute.xlu1 %284 }
  0xca   : > { %v254_v22 = vpop.xlane.xlu0 %253 }
  0xcb   : > { %v260_v23 = vmul.f32 0.0034722222, %v254_v22 }
  0xcd   : > { %v290_v25 = vmul.f32 %v270_v21, %v260_v23 }
  0xce   : > { %v259_v27 = vpop.xlane.xlu0 %258 }
  0xcf   : > { %v261_v28 = vmul.f32 0.0034722222, %v259_v27  ;;  %299 = vperm.xlu1 %861, %v290_v25  }
  0xd1   : > { %v291_v30 = vmul.f32 %v274_v29, %v261_v28  ;;  %v293_v38 = vmul.f32 %v285_v36, %v261_v28 }
  0xd2   : > { %v281_v32 = vpop.permute.xlu0 %280 }
  0xd3   : > { %302 = vperm.xlu1 %861, %v291_v30   ;;  %v292_v34 = vmul.f32 %v281_v32, %v260_v23 }
  0xd6   : > { %v347_v1 = vpop.permute.xlu0 %346 }
  0xd7   : > { %305 = vperm.xlu1 %861, %v292_v34  }
  0xda   : > { %v361_v16 = vpop.permute.xlu0 %360 }
  0xdb   : > { %308 = vperm.xlu1 %861, %v293_v38  }
  0xde   : > { %v368_v17 = vpop.permute.xlu0 %367 }
  0xdf   : > { %388 = vbcast.lane.b32.xlu1 %v386_v40, 256 }
  0xe2   : > { %v417_v18 = vpop.permute.xlu0 %416 }
  0xe3   : > { %458 = vbcast.lane.b32.xlu1 %v456_v44, 256 }
  0xe6   : > { %v424_v19 = vpop.permute.xlu0 %423 }
  0xea   : > { %v375_v20 = vpop.permute.xlu0 %374 }
  0xee   : > { %v431_v21 = vpop.permute.xlu0 %430 }
  0xf2   : > { %v382_v23 = vpop.permute.xlu0 %381 }
  0xf6   : > { %v438_v26 = vpop.permute.xlu0 %437 }
  0xfa   : > { %v445_v31 = vpop.permute.xlu0 %444 }
  0xfe   : > { %v396_v34 = vpop.permute.xlu0 %395 }
 0x102   : > { %v452_v39 = vpop.permute.xlu0 %451 }
 0x106   : > { %v403_v42 = vpop.permute.xlu0 %402 }
 0x10a   : > { %v410_v48 = vpop.permute.xlu0 %409 }
 0x14e   : > { %v300_v56 = vpop.permute.xlu1 %299 }
 0x14f   : > { %v315_v6 = vrot.slane %v300_v56, %v1160_v62 }
 0x152   : > { %v303_v59 = vpop.permute.xlu1 %302 }
 0x153   : > { %v320_v63 = vrot.slane %v303_v59, %v319_v60 }
 0x155   : > { %v322_v12 = vsel %vm321_vm1, %v320_v63, %v315_v6 }
 0x156   : > { %v306_v61 = vpop.permute.xlu1 %305 }
 0x157   : > { %v326_v7 = vrot.slane %v306_v61, %v1160_v62 }
 0x15a   : > { %v309_v2 = vpop.permute.xlu1 %308 }
 0x15b   : > { %v330_v11 = vrot.slane %v309_v2, %v319_v60 }
 0x15d   : > { %v331_v0 = vsel %vm321_vm1, %v330_v11, %v326_v7 }
 0x15e   : > { %v333_v13 = vsel %vm332_vm2, %v331_v0, %v322_v12  ;;  %v389_v22 = vpop.permute.xlu1 %388 }
 0x15f   : > { %v336_v14 = vsel %vm335_vm3, %v333_v13, 0.0 }
 0x160   : > { %337 = vadd.xlane.f32.xlu1 %v336_v14 }
 0x162   : > { %v459_v24 = vpop.permute.xlu1 %458 }
 0x171   : > { %465 = vbcast.lane.b32.xlu1 %v463_v15, 256 }
 0x1ed   : > { %v338_v25 = vpop.xlane.xlu1 %337 }
 0x1ee   : > { %v349_v27 = vadd.f32 %v347_v1, %v338_v25 }
 0x1f0   : > { %v350_v28 = vmax.f32 %v349_v27, 0.0 }
 0x1f1   : > { %v466_v47 = vpop.permute.xlu1 %465 }
 0x1f2   : > { %v483_v29 = vmul.f32 %v361_v16, %v350_v28  ;;  %v484_v30 = vmul.f32 %v368_v17, %v350_v28  ;;  %v492_v32 = vmul.f32 %v424_v19, %v350_v28  ;;  %v491_v33 = vmul.f32 %v417_v18, %v350_v28 }
 0x1f3   : > { %v493_v35 = vmul.f32 %v431_v21, %v350_v28  ;;  %v485_v36 = vmul.f32 %v375_v20, %v350_v28  ;;  %v494_v37 = vmul.f32 %v438_v26, %v350_v28  ;;  %v486_v38 = vmul.f32 %v382_v23, %v350_v28 }
 0x1f4   : > { %516 = vperm.xlu0 %862, %v483_v29   ;;  %519 = vperm.xlu1 %861, %v484_v30   ;;  %v495_v40 = vmul.f32 %v445_v31, %v350_v28  ;;  %v487_v41 = vmul.f32 %v389_v22, %v350_v28  ;;  %v496_v43 = vmul.f32 %v452_v39, %v350_v28 }
 0x1f5   : > { %v488_v44 = vmul.f32 %v396_v34, %v350_v28  ;;  %v497_v45 = vmul.f32 %v459_v24, %v350_v28  ;;  %v489_v46 = vmul.f32 %v403_v42, %v350_v28  ;;  %v498_v49 = vmul.f32 %v466_v47, %v350_v28  ;;  %v800_v42 = vld [vmem:[%s1258_s4] ss:$0 sm:$0xff] }
 0x1f6   : > { %v490_v50 = vmul.f32 %v410_v48, %v350_v28 }
 0x1f8   : > { %543 = vperm.xlu0 %862, %v492_v32   ;;  %540 = vperm.xlu1 %861, %v491_v33  }
 0x1fc   : > { %546 = vperm.xlu0 %862, %v493_v35   ;;  %522 = vperm.xlu1 %861, %v485_v36  }
 0x200   : > { %549 = vperm.xlu0 %862, %v494_v37   ;;  %525 = vperm.xlu1 %861, %v486_v38  }
 0x204   : > { %552 = vperm.xlu0 %862, %v495_v40   ;;  %528 = vperm.xlu1 %861, %v487_v41  }
 0x208   : > { %555 = vperm.xlu0 %862, %v496_v43   ;;  %531 = vperm.xlu1 %861, %v488_v44  }
 0x20c   : > { %558 = vperm.xlu0 %862, %v497_v45   ;;  %534 = vperm.xlu1 %861, %v489_v46  }
 0x210   : > { %561 = vperm.xlu0 %862, %v498_v49   ;;  %537 = vperm.xlu1 %861, %v490_v50  }
 0x273   : > { %v517_v51 = vpop.permute.xlu0 %516  ;;  %v520_v52 = vpop.permute.xlu1 %519 }
 0x274   : > { %v570_v7 = vrot.slane %v520_v52, %v1160_v62  ;;  %v566_v11 = vrot.slane %v517_v51, %v1160_v62 }
 0x276   : > { %v627_v20 = vsel %vm332_vm2, %v570_v7, %v566_v11 }
 0x277   : > { %v544_v53 = vpop.permute.xlu0 %543  ;;  %v541_v54 = vpop.permute.xlu1 %540 }
 0x278   : > { %v598_v63 = vrot.slane %v541_v54, %v1160_v62  ;;  %v602_v2 = vrot.slane %v544_v53, %v1160_v62 }
 0x27a   : > { %v640_v16 = vsel %vm332_vm2, %v602_v2, %v598_v63 }
 0x27b   : > { %v547_v55 = vpop.permute.xlu0 %546  ;;  %v523_v56 = vpop.permute.xlu1 %522 }
 0x27c   : > { %v606_v12 = vrot.slane %v547_v55, %v1160_v62  ;;  %v574_v0 = vrot.slane %v523_v56, %v1160_v62 }
 0x27e   : > { %v641_v21 = vsel %vm628_vm4, %v606_v12, %v640_v16  ;;  %v629_v24 = vsel %vm628_vm4, %v574_v0, %v627_v20 }
 0x27f   : > { %v550_v57 = vpop.permute.xlu0 %549  ;;  %v526_v58 = vpop.permute.xlu1 %525 }
 0x280   : > { %v610_v13 = vrot.slane %v550_v57, %v1160_v62  ;;  %v578_v14 = vrot.slane %v526_v58, %v1160_v62 }
 0x282   : > { %v642_v25 = vsel %vm630_vm5, %v610_v13, %v641_v21  ;;  %v631_v27 = vsel %vm630_vm5, %v578_v14, %v629_v24 }
 0x283   : > { %v553_v59 = vpop.permute.xlu0 %552  ;;  %v529_v60 = vpop.permute.xlu1 %528 }
 0x284   : > { %v614_v15 = vrot.slane %v553_v59, %v1160_v62  ;;  %v582_v17 = vrot.slane %v529_v60, %v1160_v62 }
 0x286   : > { %v643_v28 = vsel %vm632_vm6, %v614_v15, %v642_v25  ;;  %v633_v30 = vsel %vm632_vm6, %v582_v17, %v631_v27 }
 0x287   : > { %v556_v61 = vpop.permute.xlu0 %555  ;;  %v532_v6 = vpop.permute.xlu1 %531 }
 0x288   : > { %v618_v18 = vrot.slane %v556_v61, %v1160_v62  ;;  %v586_v22 = vrot.slane %v532_v6, %v1160_v62 }
 0x28a   : > { %v644_v31 = vsel %vm634_vm7, %v618_v18, %v643_v28  ;;  %v635_v34 = vsel %vm634_vm7, %v586_v22, %v633_v30 }
 0x28b   : > { %v559_v1 = vpop.permute.xlu0 %558  ;;  %v535_v19 = vpop.permute.xlu1 %534 }
 0x28c   : > { %v622_v23 = vrot.slane %v559_v1, %v1160_v62  ;;  %v590_v26 = vrot.slane %v535_v19, %v1160_v62 }
 0x28e   : > { %v645_v36 = vsel %vm636_vm8, %v622_v23, %v644_v31  ;;  %v637_v37 = vsel %vm636_vm8, %v590_v26, %v635_v34 }
 0x28f   : > { %v562_v29 = vpop.permute.xlu0 %561  ;;  %v538_v32 = vpop.permute.xlu1 %537 }
 0x290   : > { %v626_v33 = vrot.slane %v562_v29, %v1160_v62  ;;  %v594_v35 = vrot.slane %v538_v32, %v1160_v62 }
 0x292   : > { %v646_v38 = vsel %vm638_vm9, %v626_v33, %v645_v36  ;;  %v639_v39 = vsel %vm638_vm9, %v594_v35, %v637_v37 }
 0x293   : > { %v653_v40 = vsel %vm649_vm10, %v646_v38, 0.0  ;;  %v650_v41 = vsel %vm649_vm10, %v639_v39, 0.0 }
 0x294   : > { %654 = vadd.xlane.f32.xlu0 %v653_v40  ;;  %651 = vadd.xlane.f32.xlu1 %v650_v41 }
 0x2a5   : > { %667 = vbcast.lane.b32.xlu1 %v800_v42, 264 }
 0x2aa   : > { %663 = vbcast.lane.b32.xlu0 %v800_v42, 256 }
 0x321   : > { %v655_v43 = vpop.xlane.xlu0 %654  ;;  %v652_v44 = vpop.xlane.xlu1 %651 }
 0x325   : > { %v664_v45 = vpop.permute.xlu0 %663  ;;  %v668_v46 = vpop.permute.xlu1 %667 }
 0x326   : > { %v671_v47 = vadd.f32 %v664_v45, %v652_v44  ;;  %v672_v62 = vadd.f32 %v668_v46, %v655_v43 }
 0x328   : > { %v801_v48 = vmul.f32 -1.442695, %v671_v47  ;;  %v802_v49 = vmul.f32 -1.442695, %v672_v62 }
 0x32a   : > { %863 = vpow2.f32 %v801_v48 }
 0x32b   : > { %865 = vpow2.f32 %v802_v49 }
 0x334   : > { %v864_v50 = vpop.eup %863 }
 0x335   : > { %v866_v51 = vpop.eup %865  ;;  %v679_v52 = vadd.f32 1.0, %v864_v50 }
 0x336   : > { %v680_v53 = vadd.f32 1.0, %v866_v51 }
 0x337   : > { %867 = vrcp.f32 %v679_v52 }
 0x338   : > { %869 = vrcp.f32 %v680_v53 }
 0x341   : > { %v868_v54 = vpop.eup %867 }
 0x342   : > { %v870_v55 = vpop.eup %869  ;;  %687 = vperm.xlu1 %861, %v868_v54  }
 0x343   : > { %692 = vperm.xlu0 %862, %v870_v55  }
 0x3c1   : > { %v688_v56 = vpop.permute.xlu1 %687 }
 0x3c2   : > { %v695_v57 = vmul.f32 %v688_v56, %v1118_v3  ;;  %v696_v58 = vmul.f32 %v688_v56, %v1120_v4  ;;  %v697_v59 = vmul.f32 %v688_v56, %v1122_v5  ;;  %v693_v60 = vpop.permute.xlu0 %692 }
 0x3c3   : > { %v698_v61 = vmul.f32 %v693_v60, %v1128_v8  ;;  %v699_v63 = vmul.f32 %v693_v60, %v1130_v9  ;;  %v700_v2 = vmul.f32 %v693_v60, %v1132_v10 }
 0x3c4   : > { %701 = vst [vmem:[%s242_s13] sm:$0xff] %v695_v57  ;;  %702 = vst [vmem:[%s242_s13 + $0x8] sm:$0xff] %v696_v58 }
 0x3c5   : > { %703 = vst.msk [vmem:[%s242_s13 + $0x10] sm:$0xff] %vm250_vm0, %v697_v59  ;;  %704 = vst [vmem:[%s242_s13 + $0x18] sm:$0xff] %v698_v61 }
 0x3c6   : > { %705 = vst [vmem:[%s242_s13 + $0x20] sm:$0xff] %v699_v63  ;;  %706 = vst.msk [vmem:[%s242_s13 + $0x28] sm:$0xff] %vm250_vm0, %v700_v2 }
 0x3c7   : > { %914 = shalt.err (!%p911_p2)
}
 0x3c8   : > { %s915_s7 = scalar_lea.hbm %s1208_s26, 768  ;;  %s919_s9 = scalar_lea.hbm %s1259_s5, 1536 }
 0x3c9   : > { %p916_p4 = scmp.ne.s32.totalorder %s1208_s26, %s915_s7  ;;  %p920_p9 = scmp.lt.u32.totalorder %s1208_s26, %s1259_s5 }
 0x3ca   : > { %p921_p1 = scmp.lt.u32.totalorder %s919_s9, %s915_s7  ;;  %p923_p6 = scmp.lt.u32.totalorder %s915_s7, %s1208_s26 }
 0x3cb   : > { %p917_p5 = pnand %p916_p4, %p1265_p11 }
 0x3cc   : > { %p922_p3 = por %p921_p1, %p920_p9 }
 0x3cd   : > { %p918_p7 = pneg %p917_p5 }
 0x3ce   : > { %p924_p12 = por %p923_p6, %p922_p3 }
 0x3d0   : > { %p925_p13 = pnand %p924_p12, %p918_p7 }
 0x3d2   : > { %928 = shalt.err (!%p925_p13)
}
 0x3d3   : > { %s974_s25 = smov 384   ;;  %s975_s22 = smov 24  }
 0x3d4   : > { %812 = dma.vmem_to_hbm [thread:$0]  (%p1265_p11), %s1197_s16, 768, %s1208_s26, %s708_s28, %s974_s25, %s974_s25, %s975_s22  }
 0x3d5 PF: > { %s736_s23 = sand.u32 1, %s955_s18   ;;  %p1266_p8 = scmp.ne.s32.totalorder %s1263_s30, 0 }
 0x3d6   : > { %p1267_p10 = scmp.ge.s32.totalorder %s967_s21, 2  ;;  %s737_s11 = scalar_lea.sflag [#allocation4], %s736_s23 }
 0x3d8   : > { %p819_p0 = pnand %p1267_p10, %p1266_p8 }
 0x3da   : > { %950 = dma.done.wait (!%p819_p0), %s737_s11, 768  }
 0x3db   : > { %952 = vsyncadd (!%p819_p0), %s737_s11, 4294966528  ;;  %p18_p2 = scmp.ge.s32.totalorder %s1031_s24, 4   ;;  %s1268_s18 = smov %s959_s19 }
 0x3dc   : > { %s1269_s19 = smov %s963_s20  ;;  %s1270_s20 = smov %s1043_s27 }
 0x3dd   : > { %s1271_s21 = smov %s1031_s24  ;;  %20 = sbr.rel (!%p18_p2) target bundleno = 5 (0x5), region = 85 }
 0x3e4   :  { %742 = vsyncpa [#allocation3], 1 }
 0x3e5   :  { %744 = vsyncpa [#allocation3 + $0x1], 1 }
 0x3e6   :  { %745 = vsyncpa [#allocation4], 1 }
 0x3e7   :  { %747 = vsyncpa [#allocation4 + $0x1], 1 }

</bundles_post_ra>
